<compile_context>
chip_gen: v7x
topology: tpu7x:2x2x1
jax: 0.10.0
libtpu: 0.0.40
codegen_flags: <defaults>
</compile_context>

<pallas_src>
import jax
import jax.numpy as jnp
from jax import lax
from jax.experimental import pallas as pl
from jax.experimental.pallas import tpu as pltpu

_LANE = 128
_SUBLANE = 8
_SELECT_MAX_CLASSES = 32  # <=32 classes: VPU select tree; else one-hot MXU matmul


def _round_up(x: int, m: int) -> int:
    return (x + m - 1) // m * m


def _cdiv(a: int, b: int) -> int:
    return -(-a // b)


def _make_gather_kernel(use_mxu: bool):
    """Kernel: out_ref[i, :] = table_ref[targets[i], :] for one batch tile."""

    def kernel(tgt_ref, table_ref, out_ref):
        # tgt_ref  : (1, tile_b, 1) int32   (VMEM)
        # table_ref: (num_classes, feat_p)  (VMEM-resident, same block every step)
        # out_ref  : (tile_b, feat_p)
        tile_b, feat_p = out_ref.shape
        num_classes = table_ref.shape[0]
        t = tgt_ref[0]                                   # (tile_b, 1) int32

        if use_mxu:
            # One-hot matmul on the MXU. 0/1 weights in the table dtype keep the
            # gather exact (each output element is exactly one table value).
            cls = lax.broadcasted_iota(jnp.int32, (tile_b, num_classes), 1)
            one_hot = (t == cls).astype(table_ref.dtype)  # (tile_b, num_classes)
            out_ref[...] = jnp.dot(
                one_hot, table_ref[...],
                preferred_element_type=jnp.float32,
            ).astype(out_ref.dtype)
        else:
            # VPU select-accumulate tree: bit-exact for any dtype, dense vreg work.
            acc = jnp.zeros((tile_b, feat_p), out_ref.dtype)
            for c in range(num_classes):                  # static unroll (<=32)
                row = table_ref[c, :]                     # (feat_p,)
                acc = jnp.where(t == c, row, acc)         # broadcast -> (tile_b, feat_p)
            out_ref[...] = acc

    return kernel


def true_ratio_lookup(ratio_target_lookup: jax.Array,
                      targets: jax.Array,
                      *,
                      max_tile_b: int = 256,
                      min_pallas_out_bytes: int = 1 << 20) -> jax.Array:
    """out[b, :] = ratio_target_lookup[targets[b], :]  (Pallas hot path)."""
    num_classes, feat = ratio_target_lookup.shape
    batch = int(targets.shape[0])
    dtype = ratio_target_lookup.dtype
    itemsize = dtype.itemsize

    if targets.dtype != jnp.int32:
        targets = targets.astype(jnp.int32)

    # Tiny-problem fast path: Pallas dispatch overhead dwarfs a few-KiB gather.
    if batch * feat * itemsize < min_pallas_out_bytes:
        return ratio_target_lookup[targets]

    # Lane-dense feature dim (unmasked vst / dense output DMA).
    feat_p = _round_up(max(feat, _LANE), _LANE)
    table = ratio_target_lookup
    if feat_p != feat:
        table = jnp.pad(table, ((0, 0), (0, feat_p - feat)))
    table_bytes = num_classes * feat_p * itemsize

    # Tile selection bounding padding to <8 rows per tile.
    num_tiles = _cdiv(batch, max_tile_b)
    tile_b = _round_up(_cdiv(batch, num_tiles), _SUBLANE)
    padded_batch = num_tiles * tile_b

    # VMEM budget per TensorCore (double-buffered; on v7x each of the 2 TCs
    # holds its own copy of the resident table when the grid axis is sharded).
    tile_out_bytes = tile_b * feat_p * itemsize
    tgt_tile_bytes = tile_b * _LANE * 4            # (tile_b, 1) int32, lane-padded
    vmem_need = 2 * (table_bytes + tile_out_bytes + tgt_tile_bytes) + (2 << 20)
    try:
        vmem_cap = int(pltpu.get_tpu_info().vmem_capacity_bytes)
    except Exception:
        vmem_cap = 64 << 20                        # conservative (v7x per-TC)
    if vmem_need > int(0.9 * vmem_cap):
        # TODO(synk): block the table along num_classes (multi-step one-hot
        # matmul) when it cannot stay VMEM-resident; fall back to XLA for now.
        return ratio_target_lookup[targets]

    if padded_batch != batch:
        # Pad with class 0 (always in range); padded rows sliced off below.
        pad = jnp.zeros((padded_batch - batch,), jnp.int32)
        targets = jnp.concatenate([targets, pad], axis=0)
    tgt_tiles = targets.reshape(num_tiles, tile_b, 1)

    use_mxu = (num_classes > _SELECT_MAX_CLASSES
               and jnp.issubdtype(dtype, jnp.floating))
    kernel = _make_gather_kernel(use_mxu)

    compiler_kwargs = dict(dimension_semantics=("parallel",))   # v7x: 2 TCs
    if vmem_need > (16 << 20):                                   # v5e default scoped limit
        compiler_kwargs["vmem_limit_bytes"] = int(min(vmem_need + (4 << 20), vmem_cap))

    flops = 2 * padded_batch * num_classes * feat_p if use_mxu else 0
    bytes_accessed = (padded_batch * feat_p * itemsize   # output
                      + table_bytes                      # table (read once)
                      + padded_batch * 4)                # targets

    out = pl.pallas_call(
        kernel,
        out_shape=jax.ShapeDtypeStruct((padded_batch, feat_p), dtype),
        grid_spec=pltpu.PrefetchScalarGridSpec(
            num_scalar_prefetch=0,
            grid=(num_tiles,),
            in_specs=[
                # Per-tile targets block in VMEM.
                pl.BlockSpec((1, tile_b, 1), lambda b: (b, 0, 0)),
                # Whole table resident in VMEM (same block every step -> DMA'd once).
                pl.BlockSpec((num_classes, feat_p), lambda b: (0, 0)),
            ],
            out_specs=pl.BlockSpec((tile_b, feat_p), lambda b: (b, 0)),
        ),
        compiler_params=pltpu.CompilerParams(**compiler_kwargs),
        cost_estimate=pl.CostEstimate(
            flops=flops, transcendentals=0, bytes_accessed=bytes_accessed),
    )(tgt_tiles, table)

    if padded_batch != batch or feat_p != feat:
        out = out[:batch, :feat]
    return out


class TrueRatioModel:
    """JAX mirror of the PyTorch module."""

    def __init__(self, ratio_target_lookup: jax.Array):
        self.ratio_target_lookup = ratio_target_lookup
        self.use_target = True

    def __call__(self, data: jax.Array, targets: jax.Array) -> jax.Array:
        # `data` intentionally unused (.to(data.device) is a no-op here).
        del data
        return true_ratio_lookup(self.ratio_target_lookup, targets)


if __name__ == "__main__":
    key = jax.random.PRNGKey(0)
    k_table, k_targets, k_data, k_t2, k_g2, k_t3, k_g3 = jax.random.split(key, 7)

    # --- Test 1: select-tree route (num_classes <= 32), lane-dense feat -------
    num_classes, feat, batch = 10, 128, 8
    table1 = jax.random.uniform(k_table, (num_classes, feat), jnp.float32, 0.1, 5.0)
    targets1 = jax.random.randint(k_targets, (batch,), 0, num_classes, jnp.int32)
    data = jax.random.normal(k_data, (batch, 32), jnp.float32)   # unused, per reference

    model = TrueRatioModel(table1)
    out_model = jax.block_until_ready(model(data, targets1))      # tiny -> XLA fast path
    out_pallas = jax.block_until_ready(
        true_ratio_lookup(table1, targets1, min_pallas_out_bytes=0))  # force Pallas path
    ref1 = table1[targets1]
    assert out_model.shape == (batch, feat)
    assert jnp.array_equal(out_model, ref1), "model (fast-path) mismatch"
    assert jnp.array_equal(out_pallas, ref1), "Pallas select-gather mismatch"

    # --- Test 2: one-hot MXU route (num_classes > 32), padded batch -----------
    # Table values made bf16-representable so the exact-0/1-weight MXU gather is
    # bit-identical to the reference regardless of f32 matmul pass count.
    nc2, feat2, batch2 = 40, 256, 20
    table2 = jax.random.uniform(k_t2, (nc2, feat2), jnp.float32, 0.1, 5.0)
    table2 = table2.astype(jnp.bfloat16).astype(jnp.float32)
    targets2 = jax.random.randint(k_g2, (batch2,), 0, nc2, jnp.int32)
    out2 = jax.block_until_ready(
        true_ratio_lookup(table2, targets2, min_pallas_out_bytes=0))
    assert out2.shape == (batch2, feat2)
    assert jnp.array_equal(out2, table2[targets2]), "Pallas MXU-gather mismatch"

    # --- Test 3: non-lane-aligned feature dim (wrapper pads/slices) -----------
    nc3, feat3, batch3 = 6, 96, 13
    table3 = jax.random.uniform(k_t3, (nc3, feat3), jnp.float32, 0.1, 5.0)
    targets3 = jax.random.randint(k_g3, (batch3,), 0, nc3, jnp.int32)
    out3 = jax.block_until_ready(
        true_ratio_lookup(table3, targets3, min_pallas_out_bytes=0))
    assert out3.shape == (batch3, feat3)
    assert jnp.array_equal(out3, table3[targets3]), "padded feat/batch mismatch"

    print("KERNEL_OK")
</pallas_src>

<mosaic_0001>
module attributes {stable_mosaic.version = 11 : i64} {
  func.func @kernel(%arg0: i32, %arg1: memref<1x8x1xi32, #tpu.memory_space<vmem>>, %arg2: memref<10x128xf32, #tpu.memory_space<vmem>>, %arg3: memref<8x128xf32, #tpu.memory_space<vmem>>) attributes {dimension_semantics = [#tpu.dimension_semantics<parallel>], iteration_bounds = array<i64: 1>, scalar_prefetch = 0 : i64, scratch_operands = 0 : i64, tpu.core_type = #tpu.core_type<tc>, window_params = [{transform_indices = @transform_0, window_bounds = array<i64: 1, 8, 1>}, {pipeline_mode = #tpu.pipeline_mode<synchronous>, transform_indices = @transform_1, window_bounds = array<i64: 10, 128>}, {transform_indices = @transform_2, window_bounds = array<i64: 8, 128>}]} {
    %c0 = arith.constant 0 : index
    %c0_0 = arith.constant 0 : index
    %c0_1 = arith.constant 0 : index
    %0 = vector.load %arg1[%c0, %c0_0, %c0_1] : memref<1x8x1xi32, #tpu.memory_space<vmem>>, vector<1x8x1xi32>
    %1 = vector.shape_cast %0 : vector<1x8x1xi32> to vector<8x1xi32>
    %cst = arith.constant 0.000000e+00 : f32
    %2 = vector.broadcast %cst : f32 to vector<8x128xf32>
    %c0_2 = arith.constant 0 : index
    %c0_3 = arith.constant 0 : index
    %3 = vector.load %arg2[%c0_2, %c0_3] : memref<10x128xf32, #tpu.memory_space<vmem>>, vector<1x128xf32>
    %4 = vector.shape_cast %3 : vector<1x128xf32> to vector<128xf32>
    %c0_i32 = arith.constant 0 : i32
    %5 = vector.broadcast %c0_i32 : i32 to vector<8x1xi32>
    %6 = arith.cmpi eq, %1, %5 : vector<8x1xi32>
    %7 = vector.shape_cast %6 : vector<8x1xi1> to vector<8x1xi1>
    %8 = vector.broadcast %7 : vector<8x1xi1> to vector<8x128xi1>
    %9 = vector.shape_cast %4 : vector<128xf32> to vector<1x128xf32>
    %10 = vector.broadcast %9 : vector<1x128xf32> to vector<8x128xf32>
    %11 = arith.select %8, %10, %2 : vector<8x128xi1>, vector<8x128xf32>
    %c1 = arith.constant 1 : index
    %c0_4 = arith.constant 0 : index
    %12 = vector.load %arg2[%c1, %c0_4] : memref<10x128xf32, #tpu.memory_space<vmem>>, vector<1x128xf32>
    %13 = vector.shape_cast %12 : vector<1x128xf32> to vector<128xf32>
    %c1_i32 = arith.constant 1 : i32
    %14 = vector.broadcast %c1_i32 : i32 to vector<8x1xi32>
    %15 = arith.cmpi eq, %1, %14 : vector<8x1xi32>
    %16 = vector.shape_cast %15 : vector<8x1xi1> to vector<8x1xi1>
    %17 = vector.broadcast %16 : vector<8x1xi1> to vector<8x128xi1>
    %18 = vector.shape_cast %13 : vector<128xf32> to vector<1x128xf32>
    %19 = vector.broadcast %18 : vector<1x128xf32> to vector<8x128xf32>
    %20 = arith.select %17, %19, %11 : vector<8x128xi1>, vector<8x128xf32>
    %c2 = arith.constant 2 : index
    %c0_5 = arith.constant 0 : index
    %21 = vector.load %arg2[%c2, %c0_5] : memref<10x128xf32, #tpu.memory_space<vmem>>, vector<1x128xf32>
    %22 = vector.shape_cast %21 : vector<1x128xf32> to vector<128xf32>
    %c2_i32 = arith.constant 2 : i32
    %23 = vector.broadcast %c2_i32 : i32 to vector<8x1xi32>
    %24 = arith.cmpi eq, %1, %23 : vector<8x1xi32>
    %25 = vector.shape_cast %24 : vector<8x1xi1> to vector<8x1xi1>
    %26 = vector.broadcast %25 : vector<8x1xi1> to vector<8x128xi1>
    %27 = vector.shape_cast %22 : vector<128xf32> to vector<1x128xf32>
    %28 = vector.broadcast %27 : vector<1x128xf32> to vector<8x128xf32>
    %29 = arith.select %26, %28, %20 : vector<8x128xi1>, vector<8x128xf32>
    %c3 = arith.constant 3 : index
    %c0_6 = arith.constant 0 : index
    %30 = vector.load %arg2[%c3, %c0_6] : memref<10x128xf32, #tpu.memory_space<vmem>>, vector<1x128xf32>
    %31 = vector.shape_cast %30 : vector<1x128xf32> to vector<128xf32>
    %c3_i32 = arith.constant 3 : i32
    %32 = vector.broadcast %c3_i32 : i32 to vector<8x1xi32>
    %33 = arith.cmpi eq, %1, %32 : vector<8x1xi32>
    %34 = vector.shape_cast %33 : vector<8x1xi1> to vector<8x1xi1>
    %35 = vector.broadcast %34 : vector<8x1xi1> to vector<8x128xi1>
    %36 = vector.shape_cast %31 : vector<128xf32> to vector<1x128xf32>
    %37 = vector.broadcast %36 : vector<1x128xf32> to vector<8x128xf32>
    %38 = arith.select %35, %37, %29 : vector<8x128xi1>, vector<8x128xf32>
    %c4 = arith.constant 4 : index
    %c0_7 = arith.constant 0 : index
    %39 = vector.load %arg2[%c4, %c0_7] : memref<10x128xf32, #tpu.memory_space<vmem>>, vector<1x128xf32>
    %40 = vector.shape_cast %39 : vector<1x128xf32> to vector<128xf32>
    %c4_i32 = arith.constant 4 : i32
    %41 = vector.broadcast %c4_i32 : i32 to vector<8x1xi32>
    %42 = arith.cmpi eq, %1, %41 : vector<8x1xi32>
    %43 = vector.shape_cast %42 : vector<8x1xi1> to vector<8x1xi1>
    %44 = vector.broadcast %43 : vector<8x1xi1> to vector<8x128xi1>
    %45 = vector.shape_cast %40 : vector<128xf32> to vector<1x128xf32>
    %46 = vector.broadcast %45 : vector<1x128xf32> to vector<8x128xf32>
    %47 = arith.select %44, %46, %38 : vector<8x128xi1>, vector<8x128xf32>
    %c5 = arith.constant 5 : index
    %c0_8 = arith.constant 0 : index
    %48 = vector.load %arg2[%c5, %c0_8] : memref<10x128xf32, #tpu.memory_space<vmem>>, vector<1x128xf32>
    %49 = vector.shape_cast %48 : vector<1x128xf32> to vector<128xf32>
    %c5_i32 = arith.constant 5 : i32
    %50 = vector.broadcast %c5_i32 : i32 to vector<8x1xi32>
    %51 = arith.cmpi eq, %1, %50 : vector<8x1xi32>
    %52 = vector.shape_cast %51 : vector<8x1xi1> to vector<8x1xi1>
    %53 = vector.broadcast %52 : vector<8x1xi1> to vector<8x128xi1>
    %54 = vector.shape_cast %49 : vector<128xf32> to vector<1x128xf32>
    %55 = vector.broadcast %54 : vector<1x128xf32> to vector<8x128xf32>
    %56 = arith.select %53, %55, %47 : vector<8x128xi1>, vector<8x128xf32>
    %c6 = arith.constant 6 : index
    %c0_9 = arith.constant 0 : index
    %57 = vector.load %arg2[%c6, %c0_9] : memref<10x128xf32, #tpu.memory_space<vmem>>, vector<1x128xf32>
    %58 = vector.shape_cast %57 : vector<1x128xf32> to vector<128xf32>
    %c6_i32 = arith.constant 6 : i32
    %59 = vector.broadcast %c6_i32 : i32 to vector<8x1xi32>
    %60 = arith.cmpi eq, %1, %59 : vector<8x1xi32>
    %61 = vector.shape_cast %60 : vector<8x1xi1> to vector<8x1xi1>
    %62 = vector.broadcast %61 : vector<8x1xi1> to vector<8x128xi1>
    %63 = vector.shape_cast %58 : vector<128xf32> to vector<1x128xf32>
    %64 = vector.broadcast %63 : vector<1x128xf32> to vector<8x128xf32>
    %65 = arith.select %62, %64, %56 : vector<8x128xi1>, vector<8x128xf32>
    %c7 = arith.constant 7 : index
    %c0_10 = arith.constant 0 : index
    %66 = vector.load %arg2[%c7, %c0_10] : memref<10x128xf32, #tpu.memory_space<vmem>>, vector<1x128xf32>
    %67 = vector.shape_cast %66 : vector<1x128xf32> to vector<128xf32>
    %c7_i32 = arith.constant 7 : i32
    %68 = vector.broadcast %c7_i32 : i32 to vector<8x1xi32>
    %69 = arith.cmpi eq, %1, %68 : vector<8x1xi32>
    %70 = vector.shape_cast %69 : vector<8x1xi1> to vector<8x1xi1>
    %71 = vector.broadcast %70 : vector<8x1xi1> to vector<8x128xi1>
    %72 = vector.shape_cast %67 : vector<128xf32> to vector<1x128xf32>
    %73 = vector.broadcast %72 : vector<1x128xf32> to vector<8x128xf32>
    %74 = arith.select %71, %73, %65 : vector<8x128xi1>, vector<8x128xf32>
    %c8 = arith.constant 8 : index
    %c0_11 = arith.constant 0 : index
    %75 = vector.load %arg2[%c8, %c0_11] : memref<10x128xf32, #tpu.memory_space<vmem>>, vector<1x128xf32>
    %76 = vector.shape_cast %75 : vector<1x128xf32> to vector<128xf32>
    %c8_i32 = arith.constant 8 : i32
    %77 = vector.broadcast %c8_i32 : i32 to vector<8x1xi32>
    %78 = arith.cmpi eq, %1, %77 : vector<8x1xi32>
    %79 = vector.shape_cast %78 : vector<8x1xi1> to vector<8x1xi1>
    %80 = vector.broadcast %79 : vector<8x1xi1> to vector<8x128xi1>
    %81 = vector.shape_cast %76 : vector<128xf32> to vector<1x128xf32>
    %82 = vector.broadcast %81 : vector<1x128xf32> to vector<8x128xf32>
    %83 = arith.select %80, %82, %74 : vector<8x128xi1>, vector<8x128xf32>
    %c9 = arith.constant 9 : index
    %c0_12 = arith.constant 0 : index
    %84 = vector.load %arg2[%c9, %c0_12] : memref<10x128xf32, #tpu.memory_space<vmem>>, vector<1x128xf32>
    %85 = vector.shape_cast %84 : vector<1x128xf32> to vector<128xf32>
    %c9_i32 = arith.constant 9 : i32
    %86 = vector.broadcast %c9_i32 : i32 to vector<8x1xi32>
    %87 = arith.cmpi eq, %1, %86 : vector<8x1xi32>
    %88 = vector.shape_cast %87 : vector<8x1xi1> to vector<8x1xi1>
    %89 = vector.broadcast %88 : vector<8x1xi1> to vector<8x128xi1>
    %90 = vector.shape_cast %85 : vector<128xf32> to vector<1x128xf32>
    %91 = vector.broadcast %90 : vector<1x128xf32> to vector<8x128xf32>
    %92 = arith.select %89, %91, %83 : vector<8x128xi1>, vector<8x128xf32>
    %c0_13 = arith.constant 0 : index
    %c0_14 = arith.constant 0 : index
    %93 = vector.load %arg3[%c0_13, %c0_14] : memref<8x128xf32, #tpu.memory_space<vmem>>, vector<8x128xf32>
    tpu.vector_store %arg3[%c0_13, %c0_14], %92 {strides = array<i32>} : memref<8x128xf32, #tpu.memory_space<vmem>>, vector<8x128xf32>,
    return
  }
  func.func @transform_0(%arg0: i32) -> (i32, i32, i32) {
    %c0_i32 = arith.constant 0 : i32
    %c0_i32_0 = arith.constant 0 : i32
    %c0_i32_1 = arith.constant 0 : i32
    return %arg0, %c0_i32, %c0_i32_0 : i32, i32, i32
  }
  func.func @transform_1(%arg0: i32) -> (i32, i32) {
    %c0_i32 = arith.constant 0 : i32
    %c0_i32_0 = arith.constant 0 : i32
    %c0_i32_1 = arith.constant 0 : i32
    return %c0_i32, %c0_i32_0 : i32, i32
  }
  func.func @transform_2(%arg0: i32) -> (i32, i32) {
    %c0_i32 = arith.constant 0 : i32
    %c0_i32_0 = arith.constant 0 : i32
    return %arg0, %c0_i32 : i32, i32
  }
}

</mosaic_0001>

<bundles_post_ra>
// kernel: tpu_custom_call.1
= control target key start
LH: loop header
LB: loop body
LE: loop exit
PB: predicated region body
PF: predicated region fallthrough
CT: control target
= control target key end

     0   :  { %7 = vsyncpa [#allocation3], 0  ;;  %s275_s0 = inlined_call_operand.vmem [shape: s32[1,8,1], index: 0, kind: input, shape index: {}]   ;;  %s276_s1 = inlined_call_operand.hbm [shape: f32[10,128], index: 1, kind: input, shape index: {}]   ;;  %s277_s2 = inlined_call_operand.hbm [shape: f32[8,128], index: 2, kind: output, shape index: {}]  }
   0x1   :  { %8 = vsyncpa [#allocation4], 0  ;;  %s228_s9 = smov [#allocation2]   ;;  %s180_s13 = scalar_lea.hbm %s276_s1, 256 }
   0x2   :  { %s16_s10 = sshll.u32 %s228_s9, 4  ;;  %p181_p0 = scmp.ne.s32.totalorder %s276_s1, %s180_s13  ;;  %s17_s10 = int_to_ptr.vmem [resolvable:$true] %s16_s10 }
   0x3   :  { %p184_p1 = scmp.lt.u32.totalorder %s180_s13, %s276_s1 }
   0x5   :  { %p186_p2 = pnand %p184_p1, %p181_p0 }
   0x7   :  { %189 = shalt.err (!%p186_p2)
}
   0x8   :  { %s190_s18 = scalar_lea.vmem %s17_s10, 256  ;;  %p195_p4 = scmp.lt.s32.totalorder %s17_s10, %s17_s10 }
   0x9   :  { %p191_p3 = scmp.ne.s32.totalorder %s17_s10, %s190_s18  ;;  %p196_p5 = scmp.lt.s32.totalorder %s190_s18, %s190_s18 }
   0xb   :  { %p197_p6 = por %p196_p5, %p195_p4 }
   0xd   :  { %p198_p7 = pnand %p197_p6, %p191_p3 }
   0xf   :  { %201 = shalt.err (!%p198_p7)
}
  0x10   :  { %s229_s19 = smov 128   ;;  %s230_s20 = smov 8  }
  0x11   :  { %22 = dma.hbm_to_vmem [thread:$0]  %s276_s1, 256, %s17_s10, [#allocation3], %s229_s19, %s229_s19, %s230_s20  }
  0x12   :  { %224 = dma.done.wait [#allocation3], 256  }
  0x13   :  { %225 = vsyncadd [#allocation3], 4294967040  ;;  %v231_v0 = vmov 0   ;;  %v26_v1 = vld [vmem:[%s275_s0] sm:$0xff]  ;;  %v171_v35 = vld [vmem:[#allocation2 + $0x8] ss:$0 sm:$0xff] }
  0x14   :  { %179 = vset.pattern.permute.xlu1 %v231_v0  ;;  %178 = vset.pattern.permute.xlu0 %v231_v0  ;;  %vm52_vm0 = vcmp.eq.s32.totalorder %v26_v1, 2  ;;  %vm28_vm1 = vcmp.eq.s32.totalorder %v26_v1, 0  ;;  %vm64_vm2 = vcmp.eq.s32.totalorder %v26_v1, 3  ;;  %vm40_vm3 = vcmp.eq.s32.totalorder %v26_v1, 1  ;;  %v163_v14 = vld [vmem:[#allocation2] ss:$0 sm:$0xff] }
  0x15   :  { %v53_v2 = vsel %vm52_vm0, 1, %v231_v0  ;;  %v29_v3 = vsel %vm28_vm1, 1, %v231_v0  ;;  %v65_v4 = vsel %vm64_vm2, 1, %v231_v0  ;;  %v41_v5 = vsel %vm40_vm3, 1, %v231_v0  ;;  %v164_v15 = vld [vmem:[#allocation2 + $0x1] ss:$0 sm:$0xff] }
  0x16   :  { %55 = vperm.xlu1 %179, %v53_v2   ;;  %31 = vperm.xlu0 %178, %v29_v3   ;;  %vm88_vm4 = vcmp.eq.s32.totalorder %v26_v1, 5  ;;  %vm76_vm5 = vcmp.eq.s32.totalorder %v26_v1, 4  ;;  %vm112_vm6 = vcmp.eq.s32.totalorder %v26_v1, 7  ;;  %vm100_vm7 = vcmp.eq.s32.totalorder %v26_v1, 6  ;;  %v165_v17 = vld [vmem:[#allocation2 + $0x2] ss:$0 sm:$0xff] }
  0x17   :  { %v89_v6 = vsel %vm88_vm4, 1, %v231_v0  ;;  %v77_v7 = vsel %vm76_vm5, 1, %v231_v0  ;;  %v113_v8 = vsel %vm112_vm6, 1, %v231_v0  ;;  %v101_v9 = vsel %vm100_vm7, 1, %v231_v0  ;;  %v166_v20 = vld [vmem:[#allocation2 + $0x3] ss:$0 sm:$0xff] }
  0x18   :  { %vm136_vm8 = vcmp.eq.s32.totalorder %v26_v1, 9  ;;  %vm124_vm9 = vcmp.eq.s32.totalorder %v26_v1, 8  ;;  %v167_v23 = vld [vmem:[#allocation2 + $0x4] ss:$0 sm:$0xff]  ;;  %v168_v28 = vld [vmem:[#allocation2 + $0x5] ss:$0 sm:$0xff] }
  0x19   :  { %v137_v10 = vsel %vm136_vm8, 1, %v231_v0  ;;  %v125_v11 = vsel %vm124_vm9, 1, %v231_v0  ;;  %v169_v29 = vld [vmem:[#allocation2 + $0x6] ss:$0 sm:$0xff]  ;;  %v170_v34 = vld [vmem:[#allocation2 + $0x7] ss:$0 sm:$0xff] }
  0x1a   :  { %67 = vperm.xlu1 %179, %v65_v4   ;;  %43 = vperm.xlu0 %178, %v41_v5   ;;  %s232_s0 = smov [#allocation5]   ;;  %v172_v38 = vld [vmem:[#allocation2 + $0x9] ss:$0 sm:$0xff] }
  0x1b   :  { %s154_s1 = sshll.u32 %s232_s0, 4  ;;  %s155_s1 = int_to_ptr.vmem [resolvable:$true] %s154_s1 }
  0x1c   :  { %s202_s25 = scalar_lea.vmem %s155_s1, 128  ;;  %p207_p9 = scmp.lt.s32.totalorder %s155_s1, %s155_s1 }
  0x1d   :  { %p203_p8 = scmp.ne.s32.totalorder %s155_s1, %s202_s25  ;;  %p208_p10 = scmp.lt.s32.totalorder %s202_s25, %s202_s25 }
  0x1e   :  { %91 = vperm.xlu1 %179, %v89_v6   ;;  %79 = vperm.xlu0 %178, %v77_v7  }
  0x1f   :  { %p209_p11 = por %p208_p10, %p207_p9 }
  0x21   :  { %p210_p12 = pnand %p209_p11, %p203_p8 }
  0x22   :  { %115 = vperm.xlu1 %179, %v113_v8   ;;  %103 = vperm.xlu0 %178, %v101_v9  }
  0x26   :  { %139 = vperm.xlu1 %179, %v137_v10   ;;  %127 = vperm.xlu0 %178, %v125_v11  }
  0x95   :  { %v56_v12 = vpop.permute.xlu1 %55  ;;  %v32_v13 = vpop.permute.xlu0 %31 }
  0x96   :  { %vm33_vm10 = vcmp.eq.s32.totalorder %v32_v13, 1  ;;  %vm57_vm12 = vcmp.eq.s32.totalorder %v56_v12, 1 }
  0x97   :  { %v38_v19 = vsel %vm33_vm10, %v163_v14, 0.0 }
  0x99   :  { %v68_v16 = vpop.permute.xlu1 %67  ;;  %v44_v18 = vpop.permute.xlu0 %43 }
  0x9a   :  { %vm45_vm11 = vcmp.eq.s32.totalorder %v44_v18, 1  ;;  %vm69_vm13 = vcmp.eq.s32.totalorder %v68_v16, 1 }
  0x9b   :  { %v50_v21 = vsel %vm45_vm11, %v164_v15, %v38_v19 }
  0x9c   :  { %v62_v22 = vsel %vm57_vm12, %v165_v17, %v50_v21 }
  0x9d   :  { %v92_v24 = vpop.permute.xlu1 %91  ;;  %v74_v25 = vsel %vm69_vm13, %v166_v20, %v62_v22  ;;  %v80_v26 = vpop.permute.xlu0 %79 }
  0x9e   :  { %vm81_vm14 = vcmp.eq.s32.totalorder %v80_v26, 1  ;;  %vm93_vm15 = vcmp.eq.s32.totalorder %v92_v24, 1 }
  0x9f   :  { %v86_v27 = vsel %vm81_vm14, %v167_v23, %v74_v25 }
  0xa0   :  { %v98_v32 = vsel %vm93_vm15, %v168_v28, %v86_v27 }
  0xa1   :  { %v116_v30 = vpop.permute.xlu1 %115  ;;  %v104_v31 = vpop.permute.xlu0 %103 }
  0xa2   :  { %vm105_vm0 = vcmp.eq.s32.totalorder %v104_v31, 1  ;;  %vm117_vm1 = vcmp.eq.s32.totalorder %v116_v30, 1 }
  0xa3   :  { %v110_v33 = vsel %vm105_vm0, %v169_v29, %v98_v32 }
  0xa4   :  { %v122_v39 = vsel %vm117_vm1, %v170_v34, %v110_v33 }
  0xa5   :  { %v140_v36 = vpop.permute.xlu1 %139  ;;  %v128_v37 = vpop.permute.xlu0 %127 }
  0xa6   :  { %vm141_vm2 = vcmp.eq.s32.totalorder %v140_v36, 1  ;;  %vm129_vm3 = vcmp.eq.s32.totalorder %v128_v37, 1 }
  0xa7   :  { %v134_v40 = vsel %vm129_vm3, %v171_v35, %v122_v39 }
  0xa8   :  { %v146_v41 = vsel %vm141_vm2, %v172_v38, %v134_v40 }
  0xa9   :  { %147 = vst [vmem:[#allocation5] sm:$0xff] %v146_v41 }
  0xaa   :  { %213 = shalt.err (!%p210_p12)
}
  0xab   :  { %s214_s28 = scalar_lea.hbm %s277_s2, 128 }
  0xac   :  { %p215_p13 = scmp.ne.s32.totalorder %s277_s2, %s214_s28  ;;  %p218_p0 = scmp.lt.u32.totalorder %s214_s28, %s277_s2 }
  0xae   :  { %p220_p1 = pnand %p218_p0, %p215_p13 }
  0xb0   :  { %223 = shalt.err (!%p220_p1)
}
  0xb1   :  { %157 = dma.vmem_to_hbm [thread:$0]  %s155_s1, 128, %s277_s2, [#allocation4]  }
  0xb2   :  { %226 = dma.done.wait [#allocation4], 128  }
  0xb3   :  { %227 = vsyncadd [#allocation4], 4294967168 }
  0xb4   :  { %161 = vsyncpa [#allocation3], 1 }
  0xb5   :  { %162 = vsyncpa [#allocation4], 1 }

</bundles_post_ra>
